<compile_context>
chip_gen: v7x
topology: tpu7x:2x2x1
jax: 0.10.0
libtpu: 0.0.40
codegen_flags: <defaults>
</compile_context>

<pallas_src>
from typing import Any, Dict, List

import jax
import jax.numpy as jnp
from jax.experimental import pallas as pl
from jax.experimental.pallas import tpu as pltpu


_LANE = 128                      # TPU lane width
_SUBLANE_BASE = 8                # f32 sublane granularity
_MAX_TILE_R = 512                # row tile upper bound
_BASE_TILE_C_BYTES = 2048 * 4    # 8 KiB of lane bytes per row of the x tile
_VMEM_LIMIT_BYTES = 32 * 1024 * 1024


# ----------------------------------------------------------------------------
# Pallas kernel: fused per-row affine  y[r, l] = x[r, l] * a[r] + b[r]
# ----------------------------------------------------------------------------
def _affine_kernel(ab_ref, x_ref, o_ref):
    # ab_ref: (TILE_R, 256) f32; a broadcast in lanes [0:128], b in [128:256].
    # x_ref/o_ref: (TILE_R, TILE_C) in the storage dtype.
    a = ab_ref[:, 0:1]                       # (TILE_R, 1) f32
    b = ab_ref[:, _LANE:_LANE + 1]           # (TILE_R, 1) f32
    x = x_ref[...].astype(jnp.float32)       # upcast once per vreg
    o_ref[...] = (x * a + b).astype(o_ref.dtype)   # single cast on store


def _sublane_align(dtype) -> int:
    """Packed sublane granularity: 8 for f32, 16 for bf16/f16, 32 for 8-bit."""
    itemsize = jnp.dtype(dtype).itemsize
    return max(_SUBLANE_BASE, 32 // max(itemsize, 1))


def _pick_tile(dim: int, max_tile: int, align: int) -> int:
    """Largest legal tile <= max_tile.

    If the dim fits entirely under max_tile, use the full extent (always a
    legal block and within the VMEM budget).  Otherwise round max_tile DOWN
    to the alignment and let Pallas mask the ragged final block — never fall
    back to a full-extent block for large dims (VMEM-OOM hazard).
    """
    if dim <= max_tile:
        return dim
    t = (max_tile // align) * align
    return max(t, align)


def apply_channel_affine(
    x: jax.Array,
    scale: jax.Array,
    shift: jax.Array,
    *,
    donate: bool = False,
) -> jax.Array:
    """y[n,c,h,w] = x[n,c,h,w] * scale[c] + shift[c] in one lane-dense pass."""
    N, C, H, W = x.shape
    R, L = N * C, H * W
    itemsize = jnp.dtype(x.dtype).itemsize

    # Lane-dense 2-D view of the data; row r <-> channel r % C.
    xf = x.reshape(R, L)

    # Lane-dense packed coefficients (R, 256) f32: single contiguous DMA per
    # row tile and one fewer double-buffered input slot than separate a/b.
    a_rows = jnp.tile(jnp.asarray(scale, jnp.float32), N)      # (R,)
    b_rows = jnp.tile(jnp.asarray(shift, jnp.float32), N)      # (R,)
    ab_rows = jnp.concatenate(
        [jnp.broadcast_to(a_rows[:, None], (R, _LANE)),
         jnp.broadcast_to(b_rows[:, None], (R, _LANE))],
        axis=1,
    )                                                           # (R, 2*128)

    # Dtype-aware tile selection.
    sub_align = _sublane_align(x.dtype)
    max_tile_c = max(_LANE, _BASE_TILE_C_BYTES // itemsize)     # 2048 f32 / 4096 bf16
    tile_r = _pick_tile(R, _MAX_TILE_R, sub_align)
    tile_c = _pick_tile(L, max_tile_c, _LANE)

    # Guarantee >=2 grid steps where possible so v7x's two TensorCores both
    # get work under ("parallel", "parallel") semantics (no-op on v5e/v6e).
    if pl.cdiv(R, tile_r) * pl.cdiv(L, tile_c) < 2:
        if L >= 2 * _LANE:
            tile_c = max(_LANE, ((tile_c // 2) // _LANE) * _LANE)
        elif R >= 2 * sub_align:
            tile_r = max(sub_align, ((tile_r // 2) // sub_align) * sub_align)

    grid = (pl.cdiv(R, tile_r), pl.cdiv(L, tile_c))

    cost = pl.CostEstimate(
        flops=2 * R * L,
        transcendentals=0,
        bytes_accessed=2 * R * L * itemsize + R * 2 * _LANE * 4,
    )

    yf = pl.pallas_call(
        _affine_kernel,
        out_shape=jax.ShapeDtypeStruct((R, L), x.dtype),
        grid=grid,
        in_specs=[
            pl.BlockSpec((tile_r, 2 * _LANE), lambda i, j: (i, 0)),
            pl.BlockSpec((tile_r, tile_c), lambda i, j: (i, j)),
        ],
        out_specs=pl.BlockSpec((tile_r, tile_c), lambda i, j: (i, j)),
        compiler_params=pltpu.CompilerParams(
            dimension_semantics=("parallel", "parallel"),
            vmem_limit_bytes=_VMEM_LIMIT_BYTES,
        ),
        cost_estimate=cost,
        input_output_aliases=({1: 0} if donate else {}),
    )(ab_rows, xf)
    return yf.reshape(N, C, H, W)


# ----------------------------------------------------------------------------
# Concrete invertible transforms (deterministic parameters, set in __init__)
# Each exposes affine_coeffs(reverse) -> (a, b) in f32 so Compose can fuse.
# ----------------------------------------------------------------------------
class Normalize:
    """forward: (x - mean[c]) / std[c]   reverse: x * std[c] + mean[c]"""

    def __init__(self, mean: jax.Array, std: jax.Array):
        self.mean = jnp.asarray(mean, jnp.float32)
        self.std = jnp.asarray(std, jnp.float32)

    def affine_coeffs(self, reverse: bool = False):
        if reverse:
            return self.std, self.mean
        inv_std = 1.0 / self.std
        return inv_std, -self.mean * inv_std

    def __call__(self, input: Dict[str, Any], rng=None, reverse: bool = False) -> Dict[str, Any]:
        a, b = self.affine_coeffs(reverse)
        out = dict(input)
        out["data"] = apply_channel_affine(input["data"], a, b)
        return out


class Scale:
    """forward: x * factor   reverse: x / factor"""

    def __init__(self, factor: float, num_channels: int):
        self.factor = jnp.full((num_channels,), factor, dtype=jnp.float32)
        self.zero = jnp.zeros((num_channels,), dtype=jnp.float32)

    def affine_coeffs(self, reverse: bool = False):
        a = (1.0 / self.factor) if reverse else self.factor
        return a, self.zero

    def __call__(self, input: Dict[str, Any], rng=None, reverse: bool = False) -> Dict[str, Any]:
        a, b = self.affine_coeffs(reverse)
        out = dict(input)
        out["data"] = apply_channel_affine(input["data"], a, b)
        return out


# ----------------------------------------------------------------------------
# Compose — mirrors the PyTorch module's forward semantics; when every
# transform is a per-channel affine, the whole chain is fused into a single
# pallas_call (one HBM read + one HBM write for the entire Compose).
# ----------------------------------------------------------------------------
class Compose:
    DATA_PARAMETER = "data"

    def __init__(self, transforms: List[Any]):
        assert len(transforms) > 0, "At least one transform must be included in compose"
        self.transforms = transforms

    # --- coefficient fusion (host side, f32) --------------------------------
    def _all_affine(self) -> bool:
        return all(hasattr(t, "affine_coeffs") for t in self.transforms)

    def _fused_coeffs(self, reverse: bool):
        # y = a_k * ( ... (a_1 * x + b_1) ... ) + b_k
        #   => a_tot = a_k * ... * a_1, b_tot folded step by step in f32.
        seq = list(reversed(self.transforms)) if reverse else self.transforms
        a_tot = None
        b_tot = None
        for t in seq:
            a, b = t.affine_coeffs(reverse=reverse)
            a = jnp.asarray(a, jnp.float32)
            b = jnp.asarray(b, jnp.float32)
            if a_tot is None:
                a_tot, b_tot = a, b
            else:
                a_tot = a * a_tot
                b_tot = a * b_tot + b
        return a_tot, b_tot

    def _fused_apply(self, input: Dict[str, Any], reverse: bool) -> Dict[str, Any]:
        a, b = self._fused_coeffs(reverse)
        out = dict(input)
        out[self.DATA_PARAMETER] = apply_channel_affine(input[self.DATA_PARAMETER], a, b)
        return out

    # --- original Compose semantics -----------------------------------------
    def _transform(self, input: Dict[str, Any], rng=None) -> Dict[str, Any]:
        if self._all_affine():
            return self._fused_apply(input, reverse=False)
        updated_input = input
        for transform in self.transforms:
            updated_input = transform(input=updated_input, rng=rng)
        return updated_input

    def _untransform(self, input: Dict[str, Any], rng=None, **kwargs: Any) -> Dict[str, Any]:
        if self._all_affine():
            return self._fused_apply(input, reverse=True)
        transforms = list(reversed(self.transforms))
        updated_input = input
        for transform in transforms:
            updated_input = transform(input=updated_input, rng=rng, reverse=True)
        return updated_input

    def forward(self, input: Dict[str, Any], rng=None, **kwargs: Any):
        if "reverse" in kwargs.keys() and kwargs["reverse"]:
            output = self._untransform(input=input, rng=rng)
        else:
            output = self._transform(input=input, rng=rng)
        if "data_only" in kwargs.keys() and kwargs["data_only"]:
            output = output[self.DATA_PARAMETER]
        return output

    __call__ = forward


# ----------------------------------------------------------------------------
# Demo / correctness check
# ----------------------------------------------------------------------------
if __name__ == "__main__":
    key = jax.random.PRNGKey(0)
    N, C, H, W = 2, 4, 16, 16
    x = jax.random.normal(key, (N, C, H, W), dtype=jnp.float32)

    # Deterministic per-channel parameters (what the transforms' __init__ implies).
    mean = jnp.linspace(-0.5, 0.5, C, dtype=jnp.float32)
    std = jnp.linspace(0.5, 2.0, C, dtype=jnp.float32)

    compose = Compose([Normalize(mean, std), Scale(2.5, num_channels=C)])

    # Forward pass (data_only=True returns just the tensor, like the PyTorch module).
    y = jax.block_until_ready(compose({"data": x}, data_only=True))

    # Pure-JAX reference for the forward composition.
    m = mean.reshape(1, C, 1, 1)
    s = std.reshape(1, C, 1, 1)
    y_ref = ((x - m) / s) * 2.5
    assert jnp.allclose(y, y_ref, atol=1e-5, rtol=1e-5), "forward mismatch"

    # Reverse path must invert the forward path (Compose's _untransform).
    x_rec = jax.block_until_ready(compose({"data": y}, reverse=True, data_only=True))
    assert jnp.allclose(x_rec, x, atol=1e-4, rtol=1e-4), "reverse mismatch"

    # Individual transforms still work standalone (non-fused path sanity).
    y_one = jax.block_until_ready(Scale(2.5, num_channels=C)({"data": x})["data"])
    assert jnp.allclose(y_one, x * 2.5, atol=1e-5, rtol=1e-5), "single-transform mismatch"

    # Ragged / non-aligned shape exercises masked edge tiles + grid splitting.
    C2 = 5
    x2 = jax.random.normal(jax.random.PRNGKey(1), (3, C2, 17, 19), dtype=jnp.float32)
    mean2 = jnp.linspace(-1.0, 1.0, C2, dtype=jnp.float32)
    std2 = jnp.linspace(0.4, 1.6, C2, dtype=jnp.float32)
    y2 = jax.block_until_ready(
        apply_channel_affine(x2, 1.0 / std2, -mean2 / std2))
    y2_ref = (x2 - mean2.reshape(1, C2, 1, 1)) / std2.reshape(1, C2, 1, 1)
    assert jnp.allclose(y2, y2_ref, atol=1e-5, rtol=1e-5), "ragged-shape mismatch"

    print("KERNEL_OK")
</pallas_src>

<mosaic_0001>
module attributes {stable_mosaic.version = 11 : i64} {
  func.func @_affine_kernel(%arg0: i32, %arg1: i32, %arg2: memref<8x256xf32, #tpu.memory_space<vmem>>, %arg3: memref<8x128xf32, #tpu.memory_space<vmem>>, %arg4: memref<8x128xf32, #tpu.memory_space<vmem>>) attributes {dimension_semantics = [#tpu.dimension_semantics<parallel>, #tpu.dimension_semantics<parallel>], iteration_bounds = array<i64: 1, 2>, scalar_prefetch = 0 : i64, scratch_operands = 0 : i64, tpu.core_type = #tpu.core_type<tc>, window_params = [{transform_indices = @transform_0, window_bounds = array<i64: 8, 256>}, {transform_indices = @transform_1, window_bounds = array<i64: 8, 128>}, {transform_indices = @transform_2, window_bounds = array<i64: 8, 128>}]} {
    %c0 = arith.constant 0 : index
    %c0_0 = arith.constant 0 : index
    %0 = vector.load %arg2[%c0, %c0_0] : memref<8x256xf32, #tpu.memory_space<vmem>>, vector<8x1xf32>
    %c0_1 = arith.constant 0 : index
    %c128 = arith.constant 128 : index
    %1 = vector.load %arg2[%c0_1, %c128] : memref<8x256xf32, #tpu.memory_space<vmem>>, vector<8x1xf32>
    %c0_2 = arith.constant 0 : index
    %c0_3 = arith.constant 0 : index
    %2 = vector.load %arg3[%c0_2, %c0_3] : memref<8x128xf32, #tpu.memory_space<vmem>>, vector<8x128xf32>
    %3 = vector.broadcast %0 : vector<8x1xf32> to vector<8x128xf32>
    %4 = arith.mulf %2, %3 : vector<8x128xf32>
    %5 = vector.broadcast %1 : vector<8x1xf32> to vector<8x128xf32>
    %6 = arith.addf %4, %5 : vector<8x128xf32>
    %c0_4 = arith.constant 0 : index
    %c0_5 = arith.constant 0 : index
    %7 = vector.load %arg4[%c0_4, %c0_5] : memref<8x128xf32, #tpu.memory_space<vmem>>, vector<8x128xf32>
    tpu.vector_store %arg4[%c0_4, %c0_5], %6 {strides = array<i32>} : memref<8x128xf32, #tpu.memory_space<vmem>>, vector<8x128xf32>,
    return
  }
  func.func @transform_0(%arg0: i32, %arg1: i32) -> (i32, i32) {
    %c0_i32 = arith.constant 0 : i32
    %c0_i32_0 = arith.constant 0 : i32
    return %arg0, %c0_i32 : i32, i32
  }
  func.func @transform_1(%arg0: i32, %arg1: i32) -> (i32, i32) {
    %c0_i32 = arith.constant 0 : i32
    return %arg0, %arg1 : i32, i32
  }
  func.func @transform_2(%arg0: i32, %arg1: i32) -> (i32, i32) {
    %c0_i32 = arith.constant 0 : i32
    return %arg0, %arg1 : i32, i32
  }
}

</mosaic_0001>

<bundles_post_ra>
// kernel: tpu_custom_call.1
= control target key start
LH: loop header
LB: loop body
LE: loop exit
PB: predicated region body
PF: predicated region fallthrough
CT: control target
= control target key end

     0   :  { %7 = vsyncpa [#allocation3], 0  ;;  %s797_s0 = inlined_call_operand.hbm [shape: f32[8,256], index: 0, kind: input, shape index: {}]   ;;  %s798_s1 = inlined_call_operand.hbm [shape: f32[8,256], index: 1, kind: input, shape index: {}]   ;;  %s799_s2 = inlined_call_operand.hbm [shape: f32[8,256], index: 2, kind: output, shape index: {}]  }
   0x1   :  { %8 = vsyncpa [#allocation6], 0 }
   0x2   :  { %10 = vsyncpa [#allocation6 + $0x1], 0 }
   0x3   :  { %11 = vsyncpa [#allocation4], 0 }
   0x4   :  { %13 = vsyncpa [#allocation4 + $0x1], 0  ;;  %s581_s9 = smov 0   ;;  %s583_s10 = smov 0  }
   0x5   :  { %s585_s11 = smov 0   ;;  %s587_s12 = smov 0  }
   0x6   :  { %s589_s13 = smov 0   ;;  %s591_s14 = smov 0  }
   0x7 LB: > { %s326_s15 = sadd.s32 4294967295, %s560_s14   ;;  %s327_s16 = sadd.s32 4294967294, %s560_s14   ;;  %s560_s14 = sphi %s591_s14, %s19_s14   ;;  %s556_s13 = sphi %s589_s13, %s824_s13   ;;  %s552_s12 = sphi %s587_s12, %s823_s12   ;;  %s548_s11 = sphi %s585_s11, %s822_s11   ;;  %s544_s10 = sphi %s583_s10, %s821_s10   ;;  %s540_s9 = sphi %s581_s9, %s820_s9  }
   0x8   : > { %p79_p0 = scmp.ne.s32.totalorder %s544_s10, %s540_s9  ;;  %p615_p1 = scmp.eq.s32.totalorder %s326_s15, 0 }
   0x9   : > { %p619_p2 = scmp.eq.s32.totalorder %s326_s15, 1  ;;  %p111_p3 = scmp.eq.s32.totalorder %s327_s16, 1 }
   0xa   : > { %s804_s17 = scalar_select %p615_p1, 1, 0 }
   0xb   : > { %s805_s18 = scalar_select %p619_p2, 1, 0 }
   0xc   : > { %p625_p4 = por %p615_p1, %p79_p0  ;;  %p328_p5 = scmp.ge.s32.totalorder %s560_s14, 1 }
   0xd   : > { %p630_p6 = por %p111_p3, %p79_p0  ;;  %p118_p7 = scmp.lt.s32.totalorder %s560_s14, 3 }
   0xe   : > { %s806_s19 = scalar_select %p625_p4, 1, 0 }
   0xf   : > { %s807_s20 = scalar_select %p630_p6, 1, 0 }
  0x10   : > { %p635_p8 = pnand %p328_p5, %p118_p7  ;;  %s562_s22 = smov [#allocation2]  }
  0x11   : > { %s134_s23 = sshll.u32 %s562_s22, 4  ;;  %s28_s25 = sadd.s32 1, %s556_s13  ;;  %s135_s23 = int_to_ptr.vmem [resolvable:$true] %s134_s23 }
  0x12   : > { %s808_s21 = scalar_select %p635_p8, 1, 0 }
  0x13   : > { %p349_p10 = pneg %p635_p8  ;;  %s66_s26 = sadd.s32 1, %s548_s11 }
  0x14   : > { %p650_p12 = scmp.ge.s32.totalorder %s28_s25, 2  ;;  %s416_s30 = scalar_lea.hbm %s797_s0, 256 }
  0x15   : > { %p644_p11 = pnand %p349_p10, %p615_p1  ;;  %p417_p13 = scmp.ne.s32.totalorder %s797_s0, %s416_s30 }
  0x16   : > { %s810_s27 = scalar_select %p650_p12, 1, 0 }
  0x17   : > { %p418_p0 = pneg %p644_p11  ;;  %p423_p7 = scmp.lt.u32.totalorder %s416_s30, %s797_s0 }
  0x19   : > { %p419_p3 = pnand %p418_p0, %p417_p13 }
  0x1b   : > { %p420_p5 = pneg %p419_p3 }
  0x1d   : > { %p425_p10 = pnand %p423_p7, %p420_p5 }
  0x1f   : > { %428 = shalt.err (!%p425_p10)
}
  0x20   : > { %s429_s7 = scalar_lea.vmem %s135_s23, 256  ;;  %p437_p1 = scmp.lt.s32.totalorder %s135_s23, %s135_s23 }
  0x21   : > { %p430_p9 = scmp.ne.s32.totalorder %s135_s23, %s429_s7  ;;  %p438_p8 = scmp.lt.s32.totalorder %s429_s7, %s429_s7 }
  0x23   : > { %p432_p6 = pnand %p430_p9, %p418_p0  ;;  %p439_p2 = por %p438_p8, %p437_p1 }
  0x25   : > { %p433_p4 = pneg %p432_p6 }
  0x27   : > { %p440_p12 = pnand %p439_p2, %p433_p4 }
  0x29   : > { %443 = shalt.err (!%p440_p12)
}
  0x2a   : > { %352 = dma.hbm_to_vmem [thread:$0]  (!%p644_p11), %s797_s0, 256, %s135_s23, [#allocation3]  }
  0x2b   : > { %p811_p1 = scmp.ne.s32.totalorder %s810_s27, 0  ;;  %p73_p2 = scmp.ne.s32.totalorder %s548_s11, %s544_s10 }
  0x2c   : > { %p74_p4 = scmp.eq.s32.totalorder %s560_s14, 0  ;;  %p362_p6 = scmp.lt.s32.totalorder %s560_s14, 2 }
  0x2d   : > { %s826_s25 = smov (%p811_p1, %s28_s25), 0  ;;  %p812_p12 = scmp.ne.s32.totalorder %s805_s18, 0 }
  0x2e   : > { %s62_s16 = ssub.s32 %s556_s13, %s826_s25  ;;  %p75_p9 = por %p74_p4, %p73_p2 }
  0x2f   : > { %p64_p8 = scmp.eq.s32.totalorder %s62_s16, 0  ;;  %p682_p13 = por %p812_p12, %p73_p2 }
  0x30   : > { %s145_s24 = sand.u32 1, %s548_s11   ;;  %s332_s27 = sshll.u32 %s556_s13, 7 }
  0x31   : > { %s690_s28 = scalar_select %p64_p8, %s548_s11, %s66_s26  }
  0x32   : > { %s331_s23 = sshll.u32 %s145_s24, 3  ;;  %s696_s3 = scalar_lea.hbm %s798_s1, %s332_s27 }
  0x33   : > { %s149_s18 = scalar_lea.vmem [#allocation5], %s331_s23  ;;  %p700_p11 = pnand %p362_p6, %p75_p9 }
  0x34   : > { %s158_s4 = sshll.u32 %s149_s18, 4  ;;  %s146_s26 = scalar_lea.sflag [#allocation6], %s145_s24  ;;  %s698_s4 = int_to_ptr.vmem [resolvable:$true] %s158_s4 }
  0x35   : > { %s444_s6 = scalar_lea.hbm %s696_s3, 128  ;;  %p446_p3 = pneg %p700_p11 }
  0x36   : > { %p445_p0 = scmp.ne.s32.totalorder %s696_s3, %s444_s6  ;;  %s449_s15 = scalar_lea.hbm %s798_s1, 256 }
  0x37   : > { %p450_p10 = scmp.lt.u32.totalorder %s696_s3, %s798_s1  ;;  %p451_p1 = scmp.lt.u32.totalorder %s449_s15, %s444_s6 }
  0x38   : > { %p447_p5 = pnand %p446_p3, %p445_p0  ;;  %p453_p4 = scmp.lt.u32.totalorder %s444_s6, %s696_s3 }
  0x39   : > { %p452_p2 = por %p451_p1, %p450_p10 }
  0x3a   : > { %p448_p7 = pneg %p447_p5 }
  0x3b   : > { %p454_p6 = por %p453_p4, %p452_p2 }
  0x3d   : > { %p455_p8 = pnand %p454_p6, %p448_p7 }
  0x3f   : > { %458 = shalt.err (!%p455_p8)
}
  0x40   : > { %s459_s24 = scalar_lea.vmem %s698_s4, 128  ;;  %s563_s27 = smov [#allocation5]  }
  0x41   : > { %p460_p9 = scmp.ne.s32.totalorder %s698_s4, %s459_s24  ;;  %s464_s29 = sshll.u32 %s563_s27, 4  ;;  %s465_s29 = int_to_ptr.vmem [resolvable:$false] %s464_s29 }
  0x42   : > { %s466_s30 = scalar_lea.vmem %s465_s29, 256  ;;  %p467_p5 = scmp.lt.s32.totalorder %s698_s4, %s465_s29 }
  0x43   : > { %p462_p12 = pnand %p460_p9, %p446_p3  ;;  %p468_p10 = scmp.lt.s32.totalorder %s466_s30, %s459_s24 }
  0x45   : > { %p463_p0 = pneg %p462_p12  ;;  %p469_p1 = por %p468_p10, %p467_p5 }
  0x47   : > { %p470_p2 = pnand %p469_p1, %p463_p0 }
  0x49   : > { %473 = shalt.err (!%p470_p2)
}
  0x4a   : > { %356 = dma.hbm_to_vmem [thread:$0]  (!%p700_p11), %s696_s3, 128, %s698_s4, %s146_s26  }
  0x4b   : > { %p815_p7 = scmp.ne.s32.totalorder %s808_s21, 0 }
  0x4c   : > { %p816_p3 = scmp.ne.s32.totalorder (!%p815_p7), %s804_s17, 0 }
  0x4d   : > { %167 = sbr.rel (%p815_p7) target bundleno = 239 (0xef), region = 28 }
  0x54   : > { %527 = dma.done.wait (%p816_p3), [#allocation3], 256  }
  0x55   : > { %529 = vsyncadd (%p816_p3), [#allocation3], 4294967040  ;;  %s736_s18 = sand.u32 1, %s544_s10   ;;  %p817_p4 = scmp.ne.s32.totalorder %s806_s19, 0 }
  0x56   : > { %s335_s6 = sshll.u32 %s736_s18, 3  ;;  %s174_s5 = scalar_lea.sflag [#allocation6], %s736_s18 }
  0x57   : > { %s177_s7 = scalar_lea.vmem [#allocation5], %s335_s6 }
  0x58   : > { %531 = dma.done.wait (%p817_p4), %s174_s5, 128  }
  0x59   : > { %533 = vsyncadd (%p817_p4), %s174_s5, 4294967168  ;;  %v564_v0 = vmov 0   ;;  %v198_v1 = vld [vmem:[#allocation2] sm:$0xff]  ;;  %v199_v2 = vld [vmem:[#allocation2 + $0x8] sm:$0xff]  ;;  %s338_s17 = sshll.u32 %s552_s12, 7  ;;  %s197_s21 = scalar_lea.vmem [#allocation7], %s335_s6 }
  0x5a   : > { %415 = vset.pattern.permute.xlu0 %v564_v0  ;;  %v200_v3 = vld [vmem:[%s177_s7] sm:$0xff]  ;;  %s230_s3 = sshll.u32 %s197_s21, 4  ;;  %s748_s26 = scalar_lea.hbm %s799_s2, %s338_s17  ;;  %s750_s3 = int_to_ptr.vmem [resolvable:$true] %s230_s3 }
  0x5b   : > { %203 = vperm.xlu0 %415, %v198_v1   ;;  %s215_s8 = scalar_lea.sflag [#allocation4], %s736_s18  ;;  %s474_s15 = scalar_lea.vmem %s750_s3, 128 }
  0x5c   : > { %p475_p11 = scmp.ne.s32.totalorder %s750_s3, %s474_s15  ;;  %s565_s12 = smov [#allocation7]  }
  0x5d   : > { %s478_s16 = sshll.u32 %s565_s12, 4  ;;  %s479_s16 = int_to_ptr.vmem [resolvable:$false] %s478_s16 }
  0x5e   : > { %p476_p6 = pnand %p475_p11, %p682_p13  ;;  %s480_s23 = scalar_lea.vmem %s479_s16, 256 }
  0x5f   : > { %209 = vperm.xlu0 %415, %v199_v2   ;;  %p481_p9 = scmp.lt.s32.totalorder %s750_s3, %s479_s16  ;;  %p482_p12 = scmp.lt.s32.totalorder %s480_s23, %s474_s15 }
  0x60   : > { %p477_p8 = pneg %p476_p6 }
  0x61   : > { %p483_p0 = por %p482_p12, %p481_p9 }
  0x63   : > { %p484_p5 = pnand %p483_p0, %p477_p8 }
  0xda   : > { %v204_v4 = vpop.permute.xlu0 %203 }
  0xdb   : > { %v206_v5 = vmul.f32 %v204_v4, %v200_v3 }
  0xde   : > { %v210_v6 = vpop.permute.xlu0 %209 }
  0xdf   : > { %v212_v7 = vadd.f32 %v210_v6, %v206_v5 }
  0xe1   : > { %213 = vst [vmem:[%s197_s21] sm:$0xff] %v212_v7 }
  0xe2   : > { %487 = shalt.err (!%p484_p5)
}
  0xe3   : > { %s488_s24 = scalar_lea.hbm %s748_s26, 128  ;;  %s492_s30 = scalar_lea.hbm %s799_s2, 256 }
  0xe4   : > { %p489_p10 = scmp.ne.s32.totalorder %s748_s26, %s488_s24  ;;  %p493_p7 = scmp.lt.u32.totalorder %s748_s26, %s799_s2 }
  0xe5   : > { %p494_p3 = scmp.lt.u32.totalorder %s492_s30, %s488_s24  ;;  %p496_p11 = scmp.lt.u32.totalorder %s488_s24, %s748_s26 }
  0xe6   : > { %p490_p1 = pnand %p489_p10, %p682_p13 }
  0xe7   : > { %p495_p4 = por %p494_p3, %p493_p7 }
  0xe8   : > { %p491_p2 = pneg %p490_p1 }
  0xe9   : > { %p497_p6 = por %p496_p11, %p495_p4 }
  0xeb   : > { %p498_p8 = pnand %p497_p6, %p491_p2 }
  0xed   : > { %501 = shalt.err (!%p498_p8)
}
  0xee   : > { %347 = dma.vmem_to_hbm [thread:$0]  (%p682_p13), %s750_s3, 128, %s748_s26, %s215_s8  }
  0xef PF: > { %s242_s5 = sand.u32 1, %s540_s9   ;;  %p818_p9 = scmp.ne.s32.totalorder %s807_s20, 0 }
  0xf0   : > { %p819_p12 = scmp.ge.s32.totalorder %s560_s14, 2  ;;  %s243_s7 = scalar_lea.sflag [#allocation4], %s242_s5 }
  0xf2   : > { %p358_p0 = pnand %p819_p12, %p818_p9 }
  0xf4   : > { %535 = dma.done.wait (!%p358_p0), %s243_s7, 128  }
  0xf5   : > { %537 = vsyncadd (!%p358_p0), %s243_s7, 4294967168  ;;  %s19_s14 = sadd.s32 1, %s560_s14   ;;  %s820_s9 = smov %s544_s10 }
  0xf6   : > { %p16_p5 = scmp.ge.s32.totalorder %s19_s14, 4   ;;  %s821_s10 = smov %s548_s11 }
  0xf7   : > { %s822_s11 = smov %s690_s28  ;;  %s823_s12 = smov %s556_s13 }
  0xf8   : > { %s824_s13 = smov %s826_s25  ;;  %18 = sbr.rel (!%p16_p5) target bundleno = 7 (0x7), region = 79 }
  0xff   :  { %248 = vsyncpa [#allocation3], 1 }
 0x100   :  { %250 = vsyncpa [#allocation3 + $0x1], 1 }
 0x101   :  { %251 = vsyncpa [#allocation6], 1 }
 0x102   :  { %253 = vsyncpa [#allocation6 + $0x1], 1 }
 0x103   :  { %254 = vsyncpa [#allocation4], 1 }
 0x104   :  { %256 = vsyncpa [#allocation4 + $0x1], 1 }

</bundles_post_ra>
